<compile_context>
chip_gen: v7x
topology: tpu7x:2x2x1
jax: 0.10.0
libtpu: 0.0.40
codegen_flags: <defaults>
</compile_context>

<pallas_src>
import functools

import jax
import jax.numpy as jnp
from jax.experimental import pallas as pl
from jax.experimental.pallas import tpu as pltpu

FACTOR = 20.0
HIDDEN = [250, 200]
SENTENCE_VECTOR_SIZE = 300
TOTAL_KEYPOINTS = 17
IN_COORDS = TOTAL_KEYPOINTS * 3                       # 51
IN_TOTAL = IN_COORDS + SENTENCE_VECTOR_SIZE           # 351


def _round_up(x, m):
    return (x + m - 1) // m * m


COORDS_PAD = _round_up(IN_COORDS, 128)                # 128
SENT_PAD = _round_up(SENTENCE_VECTOR_SIZE, 128)       # 384
H1_PAD = _round_up(HIDDEN[0], 128)                    # 256
H2_PAD = _round_up(HIDDEN[1], 128)                    # 256
OUT_PAD = 128                                         # lane-aligned 1-wide output


# ---------------------------------------------------------------------------
# Pallas kernel: full fused MLP (one batch tile per grid step)
# ---------------------------------------------------------------------------

def _disc_mlp_kernel(coords_ref, sent_ref,
                     w1c_ref, w1s_ref, b1_ref,
                     w2_ref, b2_ref,
                     w3_ref, b3_ref,
                     o_ref):
    # Layer 1: cat(coords, sentence) @ W1 + b1, ReLU.  /factor is folded
    # into w1c rows, the concat is expressed as a sum of two partial dots.
    h = jnp.dot(coords_ref[...], w1c_ref[...], preferred_element_type=jnp.float32)
    h = h + jnp.dot(sent_ref[...], w1s_ref[...], preferred_element_type=jnp.float32)
    h = jnp.maximum(h + b1_ref[...], 0.0)

    # Layer 2
    h = jnp.dot(h.astype(w2_ref.dtype), w2_ref[...],
                preferred_element_type=jnp.float32)
    h = jnp.maximum(h + b2_ref[...], 0.0)

    # Layer 3 (no activation)
    o = jnp.dot(h.astype(w3_ref.dtype), w3_ref[...],
                preferred_element_type=jnp.float32)
    o_ref[...] = o + b3_ref[...]


def _pick_tm(mp):
    """Batch-tile: prefer >=2 grid iterations (v7x megacore) when possible."""
    if mp >= 16:
        for t in (256, 128, 64, 32, 16, 8):
            if mp % t == 0 and mp // t >= 2:
                return t
    return mp


def discriminator_r_forward(packed, input_coordinates, sentence_vector):
    """input_coordinates: (N, 51) f32, sentence_vector: (N, 300) f32 -> (N, 1) f32."""
    w1c, w1s, b1, w2, b2, w3, b3 = packed
    N = input_coordinates.shape[0]
    Mp = _round_up(max(N, 8), 8)
    tm = _pick_tm(Mp)

    coords_p = jnp.pad(
        input_coordinates.astype(jnp.float32),
        ((0, Mp - N), (0, COORDS_PAD - IN_COORDS))).astype(w1c.dtype)
    sent_p = jnp.pad(
        sentence_vector.astype(jnp.float32),
        ((0, Mp - N), (0, SENT_PAD - SENTENCE_VECTOR_SIZE))).astype(w1s.dtype)

    out = pl.pallas_call(
        _disc_mlp_kernel,
        out_shape=jax.ShapeDtypeStruct((Mp, OUT_PAD), jnp.float32),
        grid=(Mp // tm,),
        in_specs=[
            pl.BlockSpec((tm, COORDS_PAD), lambda i: (i, 0)),
            pl.BlockSpec((tm, SENT_PAD), lambda i: (i, 0)),
            pl.BlockSpec((COORDS_PAD, H1_PAD), lambda i: (0, 0)),
            pl.BlockSpec((SENT_PAD, H1_PAD), lambda i: (0, 0)),
            pl.BlockSpec((1, H1_PAD), lambda i: (0, 0)),
            pl.BlockSpec((H1_PAD, H2_PAD), lambda i: (0, 0)),
            pl.BlockSpec((1, H2_PAD), lambda i: (0, 0)),
            pl.BlockSpec((H2_PAD, OUT_PAD), lambda i: (0, 0)),
            pl.BlockSpec((1, OUT_PAD), lambda i: (0, 0)),
        ],
        out_specs=pl.BlockSpec((tm, OUT_PAD), lambda i: (i, 0)),
        compiler_params=pltpu.CompilerParams(
            dimension_semantics=("parallel",),
            vmem_limit_bytes=32 * 1024 * 1024),
    )(coords_p, sent_p, w1c, w1s, b1, w2, b2, w3, b3)
    return out[:N, :1]


# ---------------------------------------------------------------------------
# Parameter construction / packing (done once, not per forward call)
# ---------------------------------------------------------------------------

def init_params(key):
    """PyTorch-layout Linear params: weight (out, in), bias (out,)."""
    ks = jax.random.split(key, 6)

    def linear(kw, kb, fan_in, fan_out):
        bound = 1.0 / (fan_in ** 0.5)
        w = jax.random.uniform(kw, (fan_out, fan_in), jnp.float32, -bound, bound)
        b = jax.random.uniform(kb, (fan_out,), jnp.float32, -bound, bound)
        return w, b

    w1, b1 = linear(ks[0], ks[1], IN_TOTAL, HIDDEN[0])
    w2, b2 = linear(ks[2], ks[3], HIDDEN[0], HIDDEN[1])
    w3, b3 = linear(ks[4], ks[5], HIDDEN[1], 1)
    return {"w1": w1, "b1": b1, "w2": w2, "b2": b2, "w3": w3, "b3": b3}


def pack_params(params, compute_dtype=jnp.bfloat16):
    """Transpose, scale-fold (/factor), zero-pad to lane-aligned shapes, cast."""
    w1_t = params["w1"].T.astype(jnp.float32)                      # (351, 250)
    w1_t = w1_t.at[:TOTAL_KEYPOINTS * 2].multiply(1.0 / FACTOR)    # fold /factor

    w1c = jnp.zeros((COORDS_PAD, H1_PAD), jnp.float32)
    w1c = w1c.at[:IN_COORDS, :HIDDEN[0]].set(w1_t[:IN_COORDS])
    w1s = jnp.zeros((SENT_PAD, H1_PAD), jnp.float32)
    w1s = w1s.at[:SENTENCE_VECTOR_SIZE, :HIDDEN[0]].set(w1_t[IN_COORDS:])
    b1 = jnp.zeros((1, H1_PAD), jnp.float32).at[0, :HIDDEN[0]].set(params["b1"])

    w2 = jnp.zeros((H1_PAD, H2_PAD), jnp.float32)
    w2 = w2.at[:HIDDEN[0], :HIDDEN[1]].set(params["w2"].T)
    b2 = jnp.zeros((1, H2_PAD), jnp.float32).at[0, :HIDDEN[1]].set(params["b2"])

    w3 = jnp.zeros((H2_PAD, OUT_PAD), jnp.float32)
    w3 = w3.at[:HIDDEN[1], :1].set(params["w3"].T)
    b3 = jnp.zeros((1, OUT_PAD), jnp.float32).at[0, :1].set(params["b3"])

    return (w1c.astype(compute_dtype), w1s.astype(compute_dtype), b1,
            w2.astype(compute_dtype), b2,
            w3.astype(compute_dtype), b3)


def discriminator_r_reference(params, coords, sent):
    """Pure-JAX reference matching the PyTorch forward (f32)."""
    x = jnp.concatenate(
        [coords[:, :TOTAL_KEYPOINTS * 2] / FACTOR,
         coords[:, TOTAL_KEYPOINTS * 2:TOTAL_KEYPOINTS * 3],
         sent], axis=1)
    h = jnp.maximum(x @ params["w1"].T + params["b1"], 0.0)
    h = jnp.maximum(h @ params["w2"].T + params["b2"], 0.0)
    return h @ params["w3"].T + params["b3"]


if __name__ == "__main__":
    key = jax.random.PRNGKey(0)
    pkey, ckey, skey = jax.random.split(key, 3)
    params = init_params(pkey)
    packed = pack_params(params)

    N = 2
    input_coordinates = jax.random.normal(ckey, (N, IN_COORDS), dtype=jnp.float32)
    sentence_vector = jax.random.normal(skey, (N, SENTENCE_VECTOR_SIZE),
                                        dtype=jnp.float32)

    fwd = jax.jit(discriminator_r_forward)
    out = fwd(packed, input_coordinates, sentence_vector)
    out = jax.block_until_ready(out)

    assert out.shape == (N, 1), out.shape
    assert bool(jnp.all(jnp.isfinite(out)))

    ref = discriminator_r_reference(params, input_coordinates, sentence_vector)
    max_err = float(jnp.max(jnp.abs(out - ref)))
    assert max_err < 0.15, f"mismatch vs reference: {max_err}"

    print("KERNEL_OK")
</pallas_src>

<mosaic_0001>
module attributes {stable_mosaic.version = 11 : i64} {
  func.func @_disc_mlp_kernel(%arg0: i32, %arg1: memref<8x128xbf16, #tpu.memory_space<vmem>>, %arg2: memref<8x384xbf16, #tpu.memory_space<vmem>>, %arg3: memref<128x256xbf16, #tpu.memory_space<vmem>>, %arg4: memref<384x256xbf16, #tpu.memory_space<vmem>>, %arg5: memref<1x256xf32, #tpu.memory_space<vmem>>, %arg6: memref<256x256xbf16, #tpu.memory_space<vmem>>, %arg7: memref<1x256xf32, #tpu.memory_space<vmem>>, %arg8: memref<256x128xbf16, #tpu.memory_space<vmem>>, %arg9: memref<1x128xf32, #tpu.memory_space<vmem>>, %arg10: memref<8x128xf32, #tpu.memory_space<vmem>>) attributes {dimension_semantics = [#tpu.dimension_semantics<parallel>], iteration_bounds = array<i64: 1>, scalar_prefetch = 0 : i64, scratch_operands = 0 : i64, tpu.core_type = #tpu.core_type<tc>, window_params = [{transform_indices = @transform_0, window_bounds = array<i64: 8, 128>}, {transform_indices = @transform_1, window_bounds = array<i64: 8, 384>}, {pipeline_mode = #tpu.pipeline_mode<synchronous>, transform_indices = @transform_2, window_bounds = array<i64: 128, 256>}, {pipeline_mode = #tpu.pipeline_mode<synchronous>, transform_indices = @transform_3, window_bounds = array<i64: 384, 256>}, {pipeline_mode = #tpu.pipeline_mode<synchronous>, transform_indices = @transform_4, window_bounds = array<i64: 1, 256>}, {pipeline_mode = #tpu.pipeline_mode<synchronous>, transform_indices = @transform_5, window_bounds = array<i64: 256, 256>}, {pipeline_mode = #tpu.pipeline_mode<synchronous>, transform_indices = @transform_6, window_bounds = array<i64: 1, 256>}, {pipeline_mode = #tpu.pipeline_mode<synchronous>, transform_indices = @transform_7, window_bounds = array<i64: 256, 128>}, {pipeline_mode = #tpu.pipeline_mode<synchronous>, transform_indices = @transform_8, window_bounds = array<i64: 1, 128>}, {transform_indices = @transform_9, window_bounds = array<i64: 8, 128>}]} {
    %c0 = arith.constant 0 : index
    %c0_0 = arith.constant 0 : index
    %0 = vector.load %arg1[%c0, %c0_0] : memref<8x128xbf16, #tpu.memory_space<vmem>>, vector<8x128xbf16>
    %c0_1 = arith.constant 0 : index
    %c0_2 = arith.constant 0 : index
    %1 = vector.load %arg3[%c0_1, %c0_2] : memref<128x256xbf16, #tpu.memory_space<vmem>>, vector<128x256xbf16>
    %cst = arith.constant dense<0.000000e+00> : vector<8x256xf32>
    %2 = tpu.matmul %0, %1, %cst {dimension_numbers = #tpu.dot_dimension_numbers<[1], [0], [0], [1], [0, 0, 1, 1], [], []>} : vector<8x128xbf16>, vector<128x256xbf16>, vector<8x256xf32> -> vector<8x256xf32>
    %c0_3 = arith.constant 0 : index
    %c0_4 = arith.constant 0 : index
    %3 = vector.load %arg2[%c0_3, %c0_4] : memref<8x384xbf16, #tpu.memory_space<vmem>>, vector<8x384xbf16>
    %c0_5 = arith.constant 0 : index
    %c0_6 = arith.constant 0 : index
    %4 = vector.load %arg4[%c0_5, %c0_6] : memref<384x256xbf16, #tpu.memory_space<vmem>>, vector<384x256xbf16>
    %cst_7 = arith.constant dense<0.000000e+00> : vector<8x256xf32>
    %5 = tpu.matmul %3, %4, %cst_7 {dimension_numbers = #tpu.dot_dimension_numbers<[1], [0], [0], [1], [0, 0, 1, 1], [], []>} : vector<8x384xbf16>, vector<384x256xbf16>, vector<8x256xf32> -> vector<8x256xf32>
    %6 = arith.addf %2, %5 : vector<8x256xf32>
    %c0_8 = arith.constant 0 : index
    %c0_9 = arith.constant 0 : index
    %7 = vector.load %arg5[%c0_8, %c0_9] : memref<1x256xf32, #tpu.memory_space<vmem>>, vector<1x256xf32>
    %8 = vector.broadcast %7 : vector<1x256xf32> to vector<8x256xf32>
    %9 = arith.addf %6, %8 : vector<8x256xf32>
    %cst_10 = arith.constant 0.000000e+00 : f32
    %10 = vector.broadcast %cst_10 : f32 to vector<8x256xf32>
    %11 = arith.maximumf %9, %10 : vector<8x256xf32>
    %12 = arith.truncf %11 : vector<8x256xf32> to vector<8x256xbf16>
    %c0_11 = arith.constant 0 : index
    %c0_12 = arith.constant 0 : index
    %13 = vector.load %arg6[%c0_11, %c0_12] : memref<256x256xbf16, #tpu.memory_space<vmem>>, vector<256x256xbf16>
    %cst_13 = arith.constant dense<0.000000e+00> : vector<8x256xf32>
    %14 = tpu.matmul %12, %13, %cst_13 {dimension_numbers = #tpu.dot_dimension_numbers<[1], [0], [0], [1], [0, 0, 1, 1], [], []>} : vector<8x256xbf16>, vector<256x256xbf16>, vector<8x256xf32> -> vector<8x256xf32>
    %c0_14 = arith.constant 0 : index
    %c0_15 = arith.constant 0 : index
    %15 = vector.load %arg7[%c0_14, %c0_15] : memref<1x256xf32, #tpu.memory_space<vmem>>, vector<1x256xf32>
    %16 = vector.broadcast %15 : vector<1x256xf32> to vector<8x256xf32>
    %17 = arith.addf %14, %16 : vector<8x256xf32>
    %cst_16 = arith.constant 0.000000e+00 : f32
    %18 = vector.broadcast %cst_16 : f32 to vector<8x256xf32>
    %19 = arith.maximumf %17, %18 : vector<8x256xf32>
    %20 = arith.truncf %19 : vector<8x256xf32> to vector<8x256xbf16>
    %c0_17 = arith.constant 0 : index
    %c0_18 = arith.constant 0 : index
    %21 = vector.load %arg8[%c0_17, %c0_18] : memref<256x128xbf16, #tpu.memory_space<vmem>>, vector<256x128xbf16>
    %cst_19 = arith.constant dense<0.000000e+00> : vector<8x128xf32>
    %22 = tpu.matmul %20, %21, %cst_19 {dimension_numbers = #tpu.dot_dimension_numbers<[1], [0], [0], [1], [0, 0, 1, 1], [], []>} : vector<8x256xbf16>, vector<256x128xbf16>, vector<8x128xf32> -> vector<8x128xf32>
    %c0_20 = arith.constant 0 : index
    %c0_21 = arith.constant 0 : index
    %23 = vector.load %arg9[%c0_20, %c0_21] : memref<1x128xf32, #tpu.memory_space<vmem>>, vector<1x128xf32>
    %24 = vector.broadcast %23 : vector<1x128xf32> to vector<8x128xf32>
    %25 = arith.addf %22, %24 : vector<8x128xf32>
    %c0_22 = arith.constant 0 : index
    %c0_23 = arith.constant 0 : index
    %26 = vector.load %arg10[%c0_22, %c0_23] : memref<8x128xf32, #tpu.memory_space<vmem>>, vector<8x128xf32>
    tpu.vector_store %arg10[%c0_22, %c0_23], %25 {strides = array<i32>} : memref<8x128xf32, #tpu.memory_space<vmem>>, vector<8x128xf32>,
    return
  }
  func.func @transform_0(%arg0: i32) -> (i32, i32) {
    %c0_i32 = arith.constant 0 : i32
    %c0_i32_0 = arith.constant 0 : i32
    return %arg0, %c0_i32 : i32, i32
  }
  func.func @transform_1(%arg0: i32) -> (i32, i32) {
    %c0_i32 = arith.constant 0 : i32
    %c0_i32_0 = arith.constant 0 : i32
    return %arg0, %c0_i32 : i32, i32
  }
  func.func @transform_2(%arg0: i32) -> (i32, i32) {
    %c0_i32 = arith.constant 0 : i32
    %c0_i32_0 = arith.constant 0 : i32
    %c0_i32_1 = arith.constant 0 : i32
    return %c0_i32, %c0_i32_0 : i32, i32
  }
  func.func @transform_3(%arg0: i32) -> (i32, i32) {
    %c0_i32 = arith.constant 0 : i32
    %c0_i32_0 = arith.constant 0 : i32
    %c0_i32_1 = arith.constant 0 : i32
    return %c0_i32, %c0_i32_0 : i32, i32
  }
  func.func @transform_4(%arg0: i32) -> (i32, i32) {
    %c0_i32 = arith.constant 0 : i32
    %c0_i32_0 = arith.constant 0 : i32
    %c0_i32_1 = arith.constant 0 : i32
    return %c0_i32, %c0_i32_0 : i32, i32
  }
  func.func @transform_5(%arg0: i32) -> (i32, i32) {
    %c0_i32 = arith.constant 0 : i32
    %c0_i32_0 = arith.constant 0 : i32
    %c0_i32_1 = arith.constant 0 : i32
    return %c0_i32, %c0_i32_0 : i32, i32
  }
  func.func @transform_6(%arg0: i32) -> (i32, i32) {
    %c0_i32 = arith.constant 0 : i32
    %c0_i32_0 = arith.constant 0 : i32
    %c0_i32_1 = arith.constant 0 : i32
    return %c0_i32, %c0_i32_0 : i32, i32
  }
  func.func @transform_7(%arg0: i32) -> (i32, i32) {
    %c0_i32 = arith.constant 0 : i32
    %c0_i32_0 = arith.constant 0 : i32
    %c0_i32_1 = arith.constant 0 : i32
    return %c0_i32, %c0_i32_0 : i32, i32
  }
  func.func @transform_8(%arg0: i32) -> (i32, i32) {
    %c0_i32 = arith.constant 0 : i32
    %c0_i32_0 = arith.constant 0 : i32
    %c0_i32_1 = arith.constant 0 : i32
    return %c0_i32, %c0_i32_0 : i32, i32
  }
  func.func @transform_9(%arg0: i32) -> (i32, i32) {
    %c0_i32 = arith.constant 0 : i32
    %c0_i32_0 = arith.constant 0 : i32
    return %arg0, %c0_i32 : i32, i32
  }
}

</mosaic_0001>

<bundles_post_ra>
// kernel: discriminator_r_forward.1
= control target key start
LH: loop header
LB: loop body
LE: loop exit
PB: predicated region body
PF: predicated region fallthrough
CT: control target
= control target key end

     0   :  { %14 = vsyncpa [#allocation3], 0  ;;  %s1616_s0 = inlined_call_operand.vmem [shape: bf16[8,128], index: 0, kind: input, shape index: {}]   ;;  %s1617_s1 = inlined_call_operand.vmem [shape: bf16[8,384], index: 1, kind: input, shape index: {}]   ;;  %s1618_s2 = inlined_call_operand.hbm [shape: bf16[128,256], index: 2, kind: input, shape index: {}]   ;;  %s1619_s3 = inlined_call_operand.hbm [shape: bf16[384,256], index: 3, kind: input, shape index: {}]   ;;  %s1620_s4 = inlined_call_operand.vmem [shape: f32[1,256], index: 4, kind: input, shape index: {}]   ;;  %s1621_s5 = inlined_call_operand.hbm [shape: bf16[256,256], index: 5, kind: input, shape index: {}]   ;;  %s1622_s6 = inlined_call_operand.vmem [shape: f32[1,256], index: 6, kind: input, shape index: {}]   ;;  %s1623_s7 = inlined_call_operand.hbm [shape: bf16[256,128], index: 7, kind: input, shape index: {}]   ;;  %s1624_s8 = inlined_call_operand.vmem [shape: f32[1,128], index: 8, kind: input, shape index: {}]   ;;  %s1625_s9 = inlined_call_operand.vmem [shape: f32[8,128], index: 9, kind: output, shape index: {}]  }
   0x1   :  { %15 = vsyncpa [#allocation5], 0 }
   0x2   :  { %16 = vsyncpa [#allocation8], 0  ;;  %s1463_s30 = smov [#allocation4]   ;;  %s1464_s11 = smov [#allocation2]  }
   0x3   :  { %s38_s10 = sshll.u32 %s1463_s30, 4  ;;  %s26_s12 = sshll.u32 %s1464_s11, 4  ;;  %s39_s10 = int_to_ptr.vmem [resolvable:$true] %s38_s10  ;;  %s1522_s12 = int_to_ptr.vmem [resolvable:$true] %s26_s12 }
   0x4   :  { %s1369_s15 = scalar_lea.hbm %s1619_s3, 6144 }
   0x5   :  { %p1370_p0 = scmp.ne.s32.totalorder %s1619_s3, %s1369_s15  ;;  %p1373_p1 = scmp.lt.u32.totalorder %s1369_s15, %s1619_s3 }
   0x7   :  { %p1375_p2 = pnand %p1373_p1, %p1370_p0 }
   0x9   :  { %1378 = shalt.err (!%p1375_p2)
}
   0xa   :  { %s1379_s20 = scalar_lea.vmem %s39_s10, 6144  ;;  %p1384_p4 = scmp.lt.s32.totalorder %s39_s10, %s39_s10 }
   0xb   :  { %p1380_p3 = scmp.ne.s32.totalorder %s39_s10, %s1379_s20  ;;  %p1385_p5 = scmp.lt.s32.totalorder %s1379_s20, %s1379_s20 }
   0xd   :  { %p1386_p6 = por %p1385_p5, %p1384_p4 }
   0xf   :  { %p1387_p7 = pnand %p1386_p6, %p1380_p3 }
  0x11   :  { %1390 = shalt.err (!%p1387_p7)
}
  0x12   :  { %s1465_s21 = smov 128   ;;  %s1466_s22 = smov 8  }
  0x13   :  { %44 = dma.hbm_to_vmem [thread:$0]  %s1619_s3, 6144, %s39_s10, [#allocation5], %s1465_s21, %s1465_s21, %s1466_s22  }
  0x14   :  { %s1391_s27 = scalar_lea.hbm %s1618_s2, 2048 }
  0x15   :  { %p1392_p8 = scmp.ne.s32.totalorder %s1618_s2, %s1391_s27  ;;  %p1395_p9 = scmp.lt.u32.totalorder %s1391_s27, %s1618_s2 }
  0x17   :  { %p1397_p10 = pnand %p1395_p9, %p1392_p8 }
  0x19   :  { %1400 = shalt.err (!%p1397_p10)
}
  0x1a   :  { %s1401_s13 = scalar_lea.vmem %s1522_s12, 2048  ;;  %p1406_p12 = scmp.lt.s32.totalorder %s1522_s12, %s1522_s12 }
  0x1b   :  { %p1402_p11 = scmp.ne.s32.totalorder %s1522_s12, %s1401_s13  ;;  %p1407_p13 = scmp.lt.s32.totalorder %s1401_s13, %s1401_s13 }
  0x1d   :  { %p1408_p0 = por %p1407_p13, %p1406_p12 }
  0x1f   :  { %p1409_p1 = pnand %p1408_p0, %p1402_p11 }
  0x21   :  { %1412 = shalt.err (!%p1409_p1)
}
  0x22   :  { %32 = dma.hbm_to_vmem [thread:$0]  %s1618_s2, 2048, %s1522_s12, [#allocation3], %s1465_s21, %s1465_s21, %s1466_s22  }
  0x23   :  { %s1467_s14 = smov [#allocation6]   ;;  %s1468_s16 = smov [#allocation7]  }
  0x24   :  { %s52_s15 = sshll.u32 %s1467_s14, 4  ;;  %s66_s17 = sshll.u32 %s1468_s16, 4  ;;  %s53_s15 = int_to_ptr.vmem [resolvable:$true] %s52_s15  ;;  %s1559_s17 = int_to_ptr.vmem [resolvable:$true] %s66_s17 }
  0x25   :  { %s1413_s20 = scalar_lea.hbm %s1621_s5, 4096 }
  0x26   :  { %p1414_p2 = scmp.ne.s32.totalorder %s1621_s5, %s1413_s20  ;;  %p1417_p3 = scmp.lt.u32.totalorder %s1413_s20, %s1621_s5 }
  0x28   :  { %p1419_p4 = pnand %p1417_p3, %p1414_p2 }
  0x2a   :  { %1422 = shalt.err (!%p1419_p4)
}
  0x2b   :  { %s1423_s2 = scalar_lea.vmem %s53_s15, 4096  ;;  %p1428_p6 = scmp.lt.s32.totalorder %s53_s15, %s53_s15 }
  0x2c   :  { %p1424_p5 = scmp.ne.s32.totalorder %s53_s15, %s1423_s2  ;;  %p1429_p7 = scmp.lt.s32.totalorder %s1423_s2, %s1423_s2 }
  0x2e   :  { %p1430_p8 = por %p1429_p7, %p1428_p6 }
  0x30   :  { %p1431_p9 = pnand %p1430_p8, %p1424_p5 }
  0x32   :  { %1434 = shalt.err (!%p1431_p9)
}
  0x33   :  { %58 = dma.hbm_to_vmem [thread:$0]  %s1621_s5, 4096, %s53_s15, [#allocation5], %s1465_s21, %s1465_s21, %s1466_s22  }
  0x34   :  { %s1435_s30 = scalar_lea.hbm %s1623_s7, 2048 }
  0x35   :  { %p1436_p10 = scmp.ne.s32.totalorder %s1623_s7, %s1435_s30  ;;  %p1439_p11 = scmp.lt.u32.totalorder %s1435_s30, %s1623_s7 }
  0x37   :  { %p1441_p12 = pnand %p1439_p11, %p1436_p10 }
  0x39   :  { %1444 = shalt.err (!%p1441_p12)
}
  0x3a   :  { %s1445_s14 = scalar_lea.vmem %s1559_s17, 2048  ;;  %p1450_p0 = scmp.lt.s32.totalorder %s1559_s17, %s1559_s17 }
  0x3b   :  { %p1446_p13 = scmp.ne.s32.totalorder %s1559_s17, %s1445_s14  ;;  %p1451_p1 = scmp.lt.s32.totalorder %s1445_s14, %s1445_s14 }
  0x3d   :  { %p1452_p2 = por %p1451_p1, %p1450_p0 }
  0x3f   :  { %p1453_p3 = pnand %p1452_p2, %p1446_p13 }
  0x41   :  { %1456 = shalt.err (!%p1453_p3)
}
  0x42   :  { %s1469_s5 = smov 64   ;;  %s1470_s21 = smov 4  }
  0x43   :  { %72 = dma.hbm_to_vmem [thread:$0]  %s1623_s7, 2048, %s1559_s17, [#allocation8], %s1469_s5, %s1469_s5, %s1470_s21  }
  0x44   :  { %1457 = dma.done.wait [#allocation3], 2048  }
  0x45   :  { %1458 = vsyncadd [#allocation3], 4294965248 }
  0x46   :  { %1459 = dma.done.wait [#allocation5], 10240  }
  0x47   :  { %1460 = vsyncadd [#allocation5], 4294957056 }
  0x48   :  { %1461 = dma.done.wait [#allocation8], 2048  }
  0x49   :  { %1462 = vsyncadd [#allocation8], 4294965248  ;;  %v1471_v0 = vmov 0   ;;  %v1206_v1 = vld [vmem:[#allocation4 + $0x4] ss:$8 sps:$4 sm:$0xff]  }
  0x4a   :  { %479 = vmatprep.mubr.bf16.mxu1 %v1471_v0  ;;  %v1208_v2 = vld [vmem:[#allocation4 + $0x104] ss:$8 sps:$4 sm:$0xff]   ;;  %406 = vmatprep.subr.bf16.mxu0 %v1206_v1  ;;  %v1210_v3 = vld [vmem:[#allocation4] ss:$8 sps:$4 sm:$0xff]   ;;  %v1212_v5 = vld [vmem:[#allocation4 + $0x14] ss:$8 sps:$4 sm:$0xff]  }
  0x4b   :  { %v1211_v4 = vld [vmem:[#allocation4 + $0x100] ss:$8 sps:$4 sm:$0xff]   ;;  %447 = vmatprep.subr.bf16.mxu1 %v1208_v2  ;;  %407 = vmatpush1.bf16.msra.mxu0 %v1210_v3  ;;  %v1214_v6 = vld [vmem:[#allocation4 + $0x114] ss:$8 sps:$4 sm:$0xff]   ;;  %v1216_v7 = vld [vmem:[#allocation4 + $0x10] ss:$8 sps:$4 sm:$0xff]  }
  0x4c   :  { %448 = vmatpush1.bf16.msra.mxu1 %v1211_v4  ;;  %408 = vmatprep.subr.bf16.mxu0 %v1212_v5  ;;  %v1217_v8 = vld [vmem:[#allocation4 + $0x110] ss:$8 sps:$4 sm:$0xff]   ;;  %v1218_v9 = vld [vmem:[#allocation4 + $0x24] ss:$8 sps:$4 sm:$0xff]   ;;  %v1222_v11 = vld [vmem:[#allocation4 + $0x20] ss:$8 sps:$4 sm:$0xff]  }
  0x4d   :  { %449 = vmatprep.subr.bf16.mxu1 %v1214_v6  ;;  %v1220_v10 = vld [vmem:[#allocation4 + $0x124] ss:$8 sps:$4 sm:$0xff]   ;;  %v1223_v12 = vld [vmem:[#allocation4 + $0x120] ss:$8 sps:$4 sm:$0xff]   ;;  %v1224_v13 = vld [vmem:[#allocation4 + $0x34] ss:$8 sps:$4 sm:$0xff]  }
  0x4e   :  { %v1226_v14 = vld [vmem:[#allocation4 + $0x134] ss:$8 sps:$4 sm:$0xff]   ;;  %v1228_v15 = vld [vmem:[#allocation4 + $0x30] ss:$8 sps:$4 sm:$0xff]   ;;  %v1230_v17 = vld [vmem:[#allocation4 + $0x44] ss:$8 sps:$4 sm:$0xff]  }
  0x4f   :  { %409 = vmatpush1.bf16.msra.mxu0 %v1216_v7  ;;  %v1229_v16 = vld [vmem:[#allocation4 + $0x130] ss:$8 sps:$4 sm:$0xff]   ;;  %v1232_v18 = vld [vmem:[#allocation4 + $0x144] ss:$8 sps:$4 sm:$0xff]   ;;  %v1234_v19 = vld [vmem:[#allocation4 + $0x40] ss:$8 sps:$4 sm:$0xff]  }
  0x50   :  { %450 = vmatpush1.bf16.msra.mxu1 %v1217_v8  ;;  %410 = vmatprep.subr.bf16.mxu0 %v1218_v9  ;;  %v1235_v20 = vld [vmem:[#allocation4 + $0x140] ss:$8 sps:$4 sm:$0xff]   ;;  %v1236_v21 = vld [vmem:[#allocation4 + $0x54] ss:$8 sps:$4 sm:$0xff]   ;;  %v1240_v23 = vld [vmem:[#allocation4 + $0x50] ss:$8 sps:$4 sm:$0xff]  }
  0x51   :  { %451 = vmatprep.subr.bf16.mxu1 %v1220_v10  ;;  %v1238_v22 = vld [vmem:[#allocation4 + $0x154] ss:$8 sps:$4 sm:$0xff]   ;;  %v1241_v24 = vld [vmem:[#allocation4 + $0x150] ss:$8 sps:$4 sm:$0xff]   ;;  %v1242_v25 = vld [vmem:[#allocation4 + $0x64] ss:$8 sps:$4 sm:$0xff]  }
  0x52   :  { %v1244_v26 = vld [vmem:[#allocation4 + $0x164] ss:$8 sps:$4 sm:$0xff]   ;;  %v1246_v27 = vld [vmem:[#allocation4 + $0x60] ss:$8 sps:$4 sm:$0xff]   ;;  %v1248_v29 = vld [vmem:[#allocation4 + $0x74] ss:$8 sps:$4 sm:$0xff]  }
  0x53   :  { %411 = vmatpush1.bf16.msra.mxu0 %v1222_v11  ;;  %v1247_v28 = vld [vmem:[#allocation4 + $0x160] ss:$8 sps:$4 sm:$0xff]   ;;  %v1250_v30 = vld [vmem:[#allocation4 + $0x174] ss:$8 sps:$4 sm:$0xff]   ;;  %v1252_v31 = vld [vmem:[#allocation4 + $0x70] ss:$8 sps:$4 sm:$0xff]  }
  0x54   :  { %452 = vmatpush1.bf16.msra.mxu1 %v1223_v12  ;;  %412 = vmatprep.subr.bf16.mxu0 %v1224_v13  ;;  %v1253_v32 = vld [vmem:[#allocation4 + $0x170] ss:$8 sps:$4 sm:$0xff]   ;;  %v1254_v33 = vld [vmem:[#allocation4 + $0x84] ss:$8 sps:$4 sm:$0xff]   ;;  %v1256_v35 = vld [vmem:[%s1617_s1 + $0x8] ss:$0 sps:$4 sm:$0xff]  }
  0x55   :  { %453 = vmatprep.subr.bf16.mxu1 %v1226_v14  ;;  %v1259_v34 = vld [vmem:[#allocation2 + $0x4] ss:$8 sps:$4 sm:$0xff]   ;;  %v1257_v36 = vld [vmem:[#allocation2] ss:$8 sps:$4 sm:$0xff]   ;;  %v1261_v38 = vld [vmem:[#allocation4 + $0x94] ss:$8 sps:$4 sm:$0xff]  }
  0x56   :  { %v1260_v37 = vld [vmem:[#allocation4 + $0x80] ss:$8 sps:$4 sm:$0xff]   ;;  %v1265_v39 = vld [vmem:[#allocation2 + $0x14] ss:$8 sps:$4 sm:$0xff]   ;;  %v1263_v40 = vld [vmem:[#allocation2 + $0x10] ss:$8 sps:$4 sm:$0xff]  }
  0x57   :  { %413 = vmatpush1.bf16.msra.mxu0 %v1228_v15  ;;  %v1266_v41 = vld [vmem:[#allocation4 + $0x90] ss:$8 sps:$4 sm:$0xff]   ;;  %v1267_v42 = vld [vmem:[#allocation4 + $0xa4] ss:$8 sps:$4 sm:$0xff]   ;;  %v1269_v44 = vld [vmem:[#allocation2 + $0x20] ss:$8 sps:$4 sm:$0xff]  }
  0x58   :  { %454 = vmatpush1.bf16.msra.mxu1 %v1229_v16  ;;  %414 = vmatprep.subr.bf16.mxu0 %v1230_v17  ;;  %v1271_v43 = vld [vmem:[#allocation2 + $0x24] ss:$8 sps:$4 sm:$0xff]   ;;  %v1272_v45 = vld [vmem:[#allocation4 + $0xa0] ss:$8 sps:$4 sm:$0xff]   ;;  %v1273_v46 = vld [vmem:[#allocation4 + $0xb4] ss:$8 sps:$4 sm:$0xff]  }
  0x59   :  { %455 = vmatprep.subr.bf16.mxu1 %v1232_v18  ;;  %v1277_v47 = vld [vmem:[#allocation2 + $0x34] ss:$8 sps:$4 sm:$0xff]   ;;  %v1275_v48 = vld [vmem:[#allocation2 + $0x30] ss:$8 sps:$4 sm:$0xff]   ;;  %v105_v50 = vld [vmem:[%s1617_s1] sm:$0xff] }
  0x5a   :  { %v1278_v49 = vld [vmem:[#allocation4 + $0xb0] ss:$8 sps:$4 sm:$0xff]   ;;  %v1279_v51 = vld [vmem:[#allocation4 + $0xc4] ss:$8 sps:$4 sm:$0xff]   ;;  %v1060_v52 = vcombine.high %v105_v50, %v105_v50  ;;  %v1281_v54 = vld [vmem:[#allocation2 + $0x40] ss:$8 sps:$4 sm:$0xff]   ;;  %v1059_v7 = vcombine.low %v105_v50, %v105_v50 }
  0x5b   :  { %415 = vmatpush1.bf16.msra.mxu0 %v1234_v19  ;;  %v1283_v53 = vld [vmem:[#allocation2 + $0x44] ss:$8 sps:$4 sm:$0xff]   ;;  %v1284_v55 = vld [vmem:[#allocation4 + $0xc0] ss:$8 sps:$4 sm:$0xff]   ;;  %v1285_v56 = vld [vmem:[#allocation4 + $0xd4] ss:$8 sps:$4 sm:$0xff]  }
  0x5c   :  { %456 = vmatpush1.bf16.msra.mxu1 %v1235_v20  ;;  %416 = vmatprep.subr.bf16.mxu0 %v1236_v21  ;;  %v1289_v57 = vld [vmem:[#allocation2 + $0x54] ss:$8 sps:$4 sm:$0xff]   ;;  %v1287_v58 = vld [vmem:[#allocation2 + $0x50] ss:$8 sps:$4 sm:$0xff]   ;;  %v1291_v60 = vld [vmem:[#allocation4 + $0xe4] ss:$8 sps:$4 sm:$0xff]  }
  0x5d   :  { %457 = vmatprep.subr.bf16.mxu1 %v1238_v22  ;;  %438 = vmatprep.mubr.bf16.mxu0 %v1060_v52  ;;  %v1290_v59 = vld [vmem:[#allocation4 + $0xd0] ss:$8 sps:$4 sm:$0xff]   ;;  %v1295_v61 = vld [vmem:[#allocation2 + $0x64] ss:$8 sps:$4 sm:$0xff]   ;;  %v1293_v62 = vld [vmem:[#allocation2 + $0x60] ss:$8 sps:$4 sm:$0xff]  }
  0x5e   :  { %v1296_v63 = vld [vmem:[#allocation4 + $0xe0] ss:$8 sps:$4 sm:$0xff]   ;;  %v1301_v1 = vld [vmem:[#allocation2 + $0x74] ss:$8 sps:$4 sm:$0xff]   ;;  %v1299_v2 = vld [vmem:[#allocation2 + $0x70] ss:$8 sps:$4 sm:$0xff]  }
  0x5f   :  { %417 = vmatpush1.bf16.msra.mxu0 %v1240_v23  ;;  %v1302_v3 = vld [vmem:[#allocation4 + $0xf0] ss:$8 sps:$4 sm:$0xff]   ;;  %v1307_v4 = vld [vmem:[#allocation6 + $0x4] ss:$8 sps:$4 sm:$0xff]   ;;  %v88_v5 = vld [vmem:[%s1616_s0] sm:$0xf] }
  0x60   :  { %458 = vmatpush1.bf16.msra.mxu1 %v1241_v24  ;;  %418 = vmatprep.subr.bf16.mxu0 %v1242_v25  ;;  %v1305_v6 = vld [vmem:[#allocation6] ss:$8 sps:$4 sm:$0xff]   ;;  %v1310_v8 = vld [vmem:[#allocation6 + $0x14] ss:$8 sps:$4 sm:$0xff]   ;;  %v1308_v9 = vld [vmem:[#allocation6 + $0x10] ss:$8 sps:$4 sm:$0xff]  }
  0x61   :  { %459 = vmatprep.subr.bf16.mxu1 %v1244_v26  ;;  %v1313_v10 = vld [vmem:[#allocation6 + $0x24] ss:$8 sps:$4 sm:$0xff]   ;;  %v1311_v11 = vld [vmem:[#allocation6 + $0x20] ss:$8 sps:$4 sm:$0xff]   ;;  %v1316_v12 = vld [vmem:[#allocation6 + $0x34] ss:$8 sps:$4 sm:$0xff]  }
  0x62   :  { %v1314_v13 = vld [vmem:[#allocation6 + $0x30] ss:$8 sps:$4 sm:$0xff]   ;;  %v1319_v14 = vld [vmem:[#allocation6 + $0x44] ss:$8 sps:$4 sm:$0xff]   ;;  %v1317_v15 = vld [vmem:[#allocation6 + $0x40] ss:$8 sps:$4 sm:$0xff]  }
  0x63   :  { %419 = vmatpush1.bf16.msra.mxu0 %v1246_v27  ;;  %v1322_v16 = vld [vmem:[#allocation6 + $0x54] ss:$8 sps:$4 sm:$0xff]   ;;  %v1320_v17 = vld [vmem:[#allocation6 + $0x50] ss:$8 sps:$4 sm:$0xff]   ;;  %v1323_v18 = vld [vmem:[#allocation6 + $0x60] ss:$8 sps:$4 sm:$0xff]  }
  0x64   :  { %460 = vmatpush1.bf16.msra.mxu1 %v1247_v28  ;;  %420 = vmatprep.subr.bf16.mxu0 %v1248_v29  ;;  %v1325_v19 = vld [vmem:[#allocation6 + $0x64] ss:$8 sps:$4 sm:$0xff]   ;;  %v1328_v20 = vld [vmem:[#allocation6 + $0x74] ss:$8 sps:$4 sm:$0xff]   ;;  %v1326_v21 = vld [vmem:[#allocation6 + $0x70] ss:$8 sps:$4 sm:$0xff]  }
  0x65   :  { %461 = vmatprep.subr.bf16.mxu1 %v1250_v30  ;;  %v1331_v22 = vld [vmem:[#allocation6 + $0x84] ss:$8 sps:$4 sm:$0xff]   ;;  %v1329_v23 = vld [vmem:[#allocation6 + $0x80] ss:$8 sps:$4 sm:$0xff]   ;;  %v1334_v24 = vld [vmem:[#allocation6 + $0x94] ss:$8 sps:$4 sm:$0xff]  }
  0x66   :  { %v1332_v25 = vld [vmem:[#allocation6 + $0x90] ss:$8 sps:$4 sm:$0xff]   ;;  %v1337_v26 = vld [vmem:[#allocation6 + $0xa4] ss:$8 sps:$4 sm:$0xff]   ;;  %v1335_v27 = vld [vmem:[#allocation6 + $0xa0] ss:$8 sps:$4 sm:$0xff]  }
  0x67   :  { %421 = vmatpush1.bf16.msra.mxu0 %v1252_v31  ;;  %v1340_v28 = vld [vmem:[#allocation6 + $0xb4] ss:$8 sps:$4 sm:$0xff]   ;;  %v1338_v29 = vld [vmem:[#allocation6 + $0xb0] ss:$8 sps:$4 sm:$0xff]   ;;  %v1343_v30 = vld [vmem:[#allocation6 + $0xc4] ss:$8 sps:$4 sm:$0xff]  }
  0x68   :  { %462 = vmatpush1.bf16.msra.mxu1 %v1253_v32  ;;  %422 = vmatprep.subr.bf16.mxu0 %v1254_v33  ;;  %v1341_v31 = vld [vmem:[#allocation6 + $0xc0] ss:$8 sps:$4 sm:$0xff]   ;;  %v1346_v32 = vld [vmem:[#allocation6 + $0xd4] ss:$8 sps:$4 sm:$0xff]   ;;  %v1344_v33 = vld [vmem:[#allocation6 + $0xd0] ss:$8 sps:$4 sm:$0xff]  }
  0x69   :  { %568 = vmatprep.subr.bf16.mxu1 %v1259_v34  ;;  %v1349_v34 = vld [vmem:[#allocation6 + $0xe4] ss:$8 sps:$4 sm:$0xff]  }
  0x6b   :  { %480 = vmatmul.mubr.bf16.vlgmr.msra.gmra.mrb[0].mxu1 %v1256_v35  ;;  %423 = vmatpush1.bf16.msra.mxu0 %v1260_v37  ;;  %v1347_v35 = vld [vmem:[#allocation6 + $0xe0] ss:$8 sps:$4 sm:$0xff]   ;;  %v1350_v37 = vld [vmem:[#allocation6 + $0xf0] ss:$8 sps:$4 sm:$0xff]  }
  0x6c   :  { %569 = vmatpush1.bf16.msra.mxu1 %v1257_v36  ;;  %424 = vmatprep.subr.bf16.mxu0 %v1261_v38  ;;  %v1352_v36 = vld [vmem:[#allocation6 + $0xf4] ss:$8 sps:$4 sm:$0xff]   ;;  %v1353_v38 = vld [vmem:[#allocation7 + $0x40] sm:$0xff]  }
  0x6d   :  { %570 = vmatprep.subr.bf16.mxu1 %v1265_v39  ;;  %600 = vmatprep.mubr.bf16.mxu1 %v1471_v0  ;;  %v1297_v0 = vld [vmem:[#allocation4 + $0xf4] ss:$8 sps:$4 sm:$0xff]   ;;  %v1354_v39 = vld [vmem:[#allocation7] sm:$0xff]  }
  0x6f   :  { %425 = vmatpush1.bf16.msra.mxu0 %v1266_v41  ;;  %v1356_v41 = vld [vmem:[#allocation7 + $0x8] sm:$0xff]  }
  0x70   :  { %571 = vmatpush1.bf16.msra.mxu1 %v1263_v40  ;;  %426 = vmatprep.subr.bf16.mxu0 %v1267_v42  ;;  %v1355_v40 = vld [vmem:[#allocation7 + $0x48] sm:$0xff]   ;;  %v1357_v42 = vld [vmem:[#allocation7 + $0x50] sm:$0xff]  }
  0x71   :  { %572 = vmatprep.subr.bf16.mxu1 %v1271_v43  ;;  %v1358_v43 = vld [vmem:[#allocation7 + $0x10] sm:$0xff]  }
  0x73   :  { %427 = vmatpush1.bf16.msra.mxu0 %v1272_v45  ;;  %v1360_v45 = vld [vmem:[#allocation7 + $0x18] sm:$0xff]  }
  0x74   :  { %573 = vmatpush1.bf16.msra.mxu1 %v1269_v44  ;;  %428 = vmatprep.subr.bf16.mxu0 %v1273_v46  ;;  %v1359_v44 = vld [vmem:[#allocation7 + $0x58] sm:$0xff]   ;;  %v1361_v46 = vld [vmem:[#allocation7 + $0x60] sm:$0xff]  }
  0x75   :  { %574 = vmatprep.subr.bf16.mxu1 %v1277_v47  ;;  %v1362_v47 = vld [vmem:[#allocation7 + $0x20] sm:$0xff]  }
  0x77   :  { %429 = vmatpush1.bf16.msra.mxu0 %v1278_v49  ;;  %v1364_v49 = vld [vmem:[#allocation7 + $0x28] sm:$0xff]  }
  0x78   :  { %575 = vmatpush1.bf16.msra.mxu1 %v1275_v48  ;;  %430 = vmatprep.subr.bf16.mxu0 %v1279_v51  ;;  %v1363_v48 = vld [vmem:[#allocation7 + $0x68] sm:$0xff]  }
  0x79   :  { %576 = vmatprep.subr.bf16.mxu1 %v1283_v53 }
  0x7b   :  { %431 = vmatpush1.bf16.msra.mxu0 %v1284_v55 }
  0x7c   :  { %577 = vmatpush1.bf16.msra.mxu1 %v1281_v54  ;;  %432 = vmatprep.subr.bf16.mxu0 %v1285_v56  ;;  %v611_v54 = vlaneseq }
  0x7d   :  { %578 = vmatprep.subr.bf16.mxu1 %v1289_v57  ;;  %v609_v57 = vld [vmem:[%s1620_s4] sm:$0x3] }
  0x7e   :  { %v612_v55 = vshrl.u32 %v611_v54, 7 }
  0x7f   :  { %433 = vmatpush1.bf16.msra.mxu0 %v1290_v59 }
  0x80   :  { %579 = vmatpush1.bf16.msra.mxu1 %v1287_v58  ;;  %434 = vmatprep.subr.bf16.mxu0 %v1291_v60  ;;  %v613_v56 = vsub.s32 0, %v612_v55  ;;  %v617_v58 = vsub.s32 1, %v612_v55 }
  0x81   :  { %580 = vmatprep.subr.bf16.mxu1 %v1295_v61 }
  0x83   :  { %435 = vmatpush1.bf16.msra.mxu0 %v1296_v63 }
  0x84   :  { %581 = vmatpush1.bf16.msra.mxu1 %v1293_v62  ;;  %436 = vmatprep.subr.bf16.mxu0 %v1297_v0  ;;  %v614_v62 = vrot.slane %v609_v57, %v613_v56 }
  0x85   :  { %582 = vmatprep.subr.bf16.mxu1 %v1301_v1 }
  0x87   :  { %437 = vmatpush1.bf16.msra.mxu0 %v1302_v3 }
  0x88   :  { %583 = vmatpush1.bf16.msra.mxu1 %v1299_v2  ;;  %831 = vmatprep.subr.bf16.mxu0 %v1307_v4  ;;  %v618_v2 = vrot.slane %v609_v57, %v617_v58 }
  0x89   :  { %1175 = vmatprep.subr.bf16.mxu1 %v1353_v38 }
  0x8a   :  { %439 = vmatmul.mubr.bf16.vlgmr.msra.gmra.mrb[0].mxu0 %v1059_v7 }
  0x8b   :  { %601 = vmatmul.mubr.bf16.vlgmr.msra.gmra.mrb[4].mxu1 %v88_v5  ;;  %832 = vmatpush1.bf16.msra.mxu0 %v1305_v6 }
  0x8c   :  { %833 = vmatprep.subr.bf16.mxu0 %v1310_v8  ;;  %1176 = vmatpush3.bf16.msra.mxu1 %v1354_v39 }
  0x8d   :  { %1177 = vmatprep.subr.bf16.mxu1 %v1355_v40 }
  0x8f   :  { %834 = vmatpush1.bf16.msra.mxu0 %v1308_v9 }
  0x90   :  { %835 = vmatprep.subr.bf16.mxu0 %v1313_v10  ;;  %1178 = vmatpush3.bf16.msra.mxu1 %v1356_v41 }
  0x91   :  { %1179 = vmatprep.subr.bf16.mxu1 %v1357_v42 }
  0x93   :  { %836 = vmatpush1.bf16.msra.mxu0 %v1311_v11 }
  0x94   :  { %837 = vmatprep.subr.bf16.mxu0 %v1316_v12  ;;  %1180 = vmatpush3.bf16.msra.mxu1 %v1358_v43 }
  0x95   :  { %1181 = vmatprep.subr.bf16.mxu1 %v1359_v44 }
  0x97   :  { %838 = vmatpush1.bf16.msra.mxu0 %v1314_v13 }
  0x98   :  { %839 = vmatprep.subr.bf16.mxu0 %v1319_v14  ;;  %1182 = vmatpush3.bf16.msra.mxu1 %v1360_v45 }
  0x99   :  { %1183 = vmatprep.subr.bf16.mxu1 %v1361_v46 }
  0x9b   :  { %840 = vmatpush1.bf16.msra.mxu0 %v1317_v15  ;;  %v1365_v15 = vld [vmem:[#allocation7 + $0x70] sm:$0xff]  }
  0x9c   :  { %841 = vmatprep.subr.bf16.mxu0 %v1322_v16  ;;  %1184 = vmatpush3.bf16.msra.mxu1 %v1362_v47  ;;  %v1366_v16 = vld [vmem:[#allocation7 + $0x30] sm:$0xff]  }
  0x9d   :  { %1185 = vmatprep.subr.bf16.mxu1 %v1363_v48 }
  0x9f   :  { %842 = vmatpush1.bf16.msra.mxu0 %v1320_v17  ;;  %v1367_v17 = vld [vmem:[#allocation7 + $0x78] sm:$0xff]  }
  0xa0   :  { %843 = vmatprep.subr.bf16.mxu0 %v1325_v19  ;;  %1186 = vmatpush3.bf16.msra.mxu1 %v1364_v49  ;;  %v659_v19 = vld [vmem:[%s1622_s6] sm:$0x3] }
  0xa1   :  { %1187 = vmatprep.subr.bf16.mxu1 %v1365_v15 }
  0xa3   :  { %844 = vmatpush1.bf16.msra.mxu0 %v1323_v18  ;;  %v1368_v18 = vld [vmem:[#allocation7 + $0x38] sm:$0xff]  }
  0xa4   :  { %845 = vmatprep.subr.bf16.mxu0 %v1328_v20  ;;  %1188 = vmatpush3.bf16.msra.mxu1 %v1366_v16  ;;  %v664_v20 = vrot.slane %v659_v19, %v613_v56 }
  0xa5   :  { %1189 = vmatprep.subr.bf16.mxu1 %v1367_v17 }
  0xa7   :  { %846 = vmatpush1.bf16.msra.mxu0 %v1326_v21  ;;  %v668_v21 = vrot.slane %v659_v19, %v617_v58 }
  0xa8   :  { %847 = vmatprep.subr.bf16.mxu0 %v1331_v22  ;;  %1190 = vmatpush3.bf16.msra.mxu1 %v1368_v18 }
  0xab   :  { %848 = vmatpush1.bf16.msra.mxu0 %v1329_v23 }
  0xac   :  { %849 = vmatprep.subr.bf16.mxu0 %v1334_v24 }
  0xaf   :  { %850 = vmatpush1.bf16.msra.mxu0 %v1332_v25 }
  0xb0   :  { %851 = vmatprep.subr.bf16.mxu0 %v1337_v26 }
  0xb3   :  { %852 = vmatpush1.bf16.msra.mxu0 %v1335_v27 }
  0xb4   :  { %853 = vmatprep.subr.bf16.mxu0 %v1340_v28 }
  0xb7   :  { %854 = vmatpush1.bf16.msra.mxu0 %v1338_v29 }
  0xb8   :  { %855 = vmatprep.subr.bf16.mxu0 %v1343_v30 }
  0xbb   :  { %856 = vmatpush1.bf16.msra.mxu0 %v1341_v31 }
  0xbc   :  { %857 = vmatprep.subr.bf16.mxu0 %v1346_v32 }
  0xbf   :  { %858 = vmatpush1.bf16.msra.mxu0 %v1344_v33  ;;  %v1158_v33 = vld [vmem:[%s1624_s8] ss:$0 sm:$0xff] }
  0xc0   :  { %859 = vmatprep.subr.bf16.mxu0 %v1349_v34 }
  0xc3   :  { %860 = vmatpush1.bf16.msra.mxu0 %v1347_v35 }
  0xc4   :  { %861 = vmatprep.subr.bf16.mxu0 %v1352_v36 }
  0xc7   :  { %862 = vmatpush1.bf16.msra.mxu0 %v1350_v37 }
 0x13e   :  { %v481_v50 = vpop.f32.mrb[0].mxu1 }
 0x13f   :  { %v483_v51 = vpop.f32.mrb[1].mxu1 }
 0x140   :  { %v485_v52 = vpop.f32.mrb[2].mxu1 }
 0x141   :  { %v486_v53 = vpop.f32.mrb[3].mxu1 }
 0x15d   :  { %v440_v59 = vpop.f32.mrb[0].mxu0 }
 0x15e   :  { %v602_v60 = vpop.f32.mrb[4].mxu1  ;;  %v482_v61 = vadd.f32 %v481_v50, %v440_v59  ;;  %v442_v63 = vpop.f32.mrb[1].mxu0 }
 0x15f   :  { %v604_v0 = vpop.f32.mrb[5].mxu1  ;;  %v484_v1 = vadd.f32 %v483_v51, %v442_v63  ;;  %v444_v3 = vpop.f32.mrb[2].mxu0 }
 0x160   :  { %v606_v4 = vpop.f32.mrb[6].mxu1  ;;  %v603_v5 = vadd.f32 %v602_v60, %v482_v61  ;;  %v445_v6 = vpop.f32.mrb[3].mxu0 }
 0x161   :  { %v607_v7 = vpop.f32.mrb[7].mxu1  ;;  %v605_v8 = vadd.f32 %v604_v0, %v484_v1 }
 0x162   :  { %v621_v9 = vadd.f32 %v614_v62, %v603_v5 }
 0x163   :  { %v622_v10 = vadd.f32 %v618_v2, %v605_v8 }
 0x164   :  { %v623_v11 = vmax.f32 %v621_v9, 0.0 }
 0x165   :  { %v624_v12 = vmax.f32 %v622_v10, 0.0 }
 0x166   :  { %v625_v14 = vpack.c.bf16 %v623_v11, %v623_v11 }
 0x167   :  { %v626_v13 = vpack.c.bf16 %v624_v12, %v624_v12 }
 0x169   :  { %863 = vmatprep.mubr.bf16.mxu0 %v626_v13 }
 0x16a   :  { %864 = vmatmul.mubr.bf16.vlgmr.msra.gmra.mrb[4].mxu0 %v625_v14 }
 0x23d   :  { %v865_v22 = vpop.f32.mrb[4].mxu0 }
 0x23e   :  { %v866_v23 = vadd.f32 %v865_v22, %v664_v20  ;;  %v867_v24 = vpop.f32.mrb[5].mxu0 }
 0x23f   :  { %v868_v25 = vadd.f32 %v867_v24, %v668_v21  ;;  %v869_v26 = vpop.f32.mrb[6].mxu0 }
 0x240   :  { %v872_v27 = vmax.f32 %v866_v23, 0.0  ;;  %v870_v28 = vpop.f32.mrb[7].mxu0 }
 0x241   :  { %v873_v29 = vmax.f32 %v868_v25, 0.0 }
 0x242   :  { %v874_v31 = vpack.c.bf16 %v872_v27, %v872_v27 }
 0x243   :  { %v875_v30 = vpack.c.bf16 %v873_v29, %v873_v29 }
 0x245   :  { %1043 = vmatprep.mubr.bf16.mxu1 %v875_v30 }
 0x246   :  { %1044 = vmatmul.mubr.bf16.vlgmr.msra.gmra.mrb[8].mxu1 %v874_v31 }
 0x319   :  { %v1191_v32 = vpop.f32.mrb[8].mxu1 }
 0x31a   :  { %v1192_v34 = vpop.f32.mrb[9].mxu1 }
 0x31b   :  { %v1193_v35 = vadd.f32 %v1192_v34, %v1191_v32  ;;  %v1194_v36 = vpop.f32.mrb[10].mxu1 }
 0x31c   :  { %v1195_v37 = vpop.f32.mrb[11].mxu1 }
 0x31d   :  { %v1046_v38 = vadd.f32 %v1193_v35, %v1158_v33 }
 0x31f   :  { %1051 = vst [vmem:[%s1625_s9] sm:$0xff] %v1046_v38 }
 0x320   :  { %1056 = vsyncpa [#allocation3], 1 }
 0x321   :  { %1057 = vsyncpa [#allocation5], 1 }
 0x322   :  { %1058 = vsyncpa [#allocation8], 1 }

</bundles_post_ra>
